<compile_context>
chip_gen: v5e
topology: v5e:2x2
jax: 0.10.0
libtpu: 0.0.40
codegen_flags: <defaults>
</compile_context>

<pallas_src>
import math

import jax
import jax.numpy as jnp
from jax.experimental import pallas as pl
from jax.experimental.pallas import tpu as pltpu


def _round_up(x: int, m: int) -> int:
    return ((x + m - 1) // m) * m


def _cdiv(a: int, b: int) -> int:
    return (a + b - 1) // b


def _linear_bias_kernel(x_ref, w_ref, b_ref, o_ref):
    # Single-K path: x_ref (tm, K), w_ref (K, tn), b_ref (1, tn), o_ref (tm, tn).
    acc = jnp.dot(x_ref[...], w_ref[...], preferred_element_type=jnp.float32)
    o_ref[...] = (acc + b_ref[...].astype(jnp.float32)).astype(o_ref.dtype)


def _linear_bias_acc_kernel(x_ref, w_ref, b_ref, o_ref, acc_ref):
    # Multi-K path: K is the innermost grid axis, f32 VMEM accumulator.
    k = pl.program_id(2)

    @pl.when(k == 0)
    def _init():
        acc_ref[...] = jnp.zeros_like(acc_ref)

    acc_ref[...] += jnp.dot(x_ref[...], w_ref[...], preferred_element_type=jnp.float32)

    @pl.when(k == pl.num_programs(2) - 1)
    def _finalize():
        o_ref[...] = (acc_ref[...] + b_ref[...].astype(jnp.float32)).astype(o_ref.dtype)


def stream_embed_linear(x, weight, bias, *, tm=None, tn=None, tk=None):
    """Pallas implementation of StreamEmbedLinear.forward.

    x      : (..., A, B) with A*B == dim_in
    weight : (dim_out, dim_in)   (PyTorch nn.Linear layout)
    bias   : (dim_out,)
    returns: (..., dim_out)
    """
    dim_out, dim_in = weight.shape
    assert x.shape[-1] * x.shape[-2] == dim_in, "last two dims must flatten to dim_in"

    lead_shape = x.shape[:-2]
    m = int(math.prod(lead_shape)) if lead_shape else 1
    out_dtype = x.dtype

    if m == 0:
        return jnp.zeros((*lead_shape, dim_out), dtype=out_dtype)

    x_flat = x.reshape(m, dim_in)      # metadata-only flatten of trailing dims
    w_kn = weight.T                    # one-time (K, N) transpose of a small param
    b2d = bias.reshape(1, dim_out)

    xsz = jnp.dtype(x.dtype).itemsize
    wsz = jnp.dtype(weight.dtype).itemsize
    bsz = jnp.dtype(bias.dtype).itemsize
    osz = jnp.dtype(out_dtype).itemsize

    # ---------------- K: single full tile whenever reasonable ----------------
    SINGLE_K_MAX = 2048
    if tk is not None:
        tk_eff = tk
        k_ext = dim_in if dim_in % tk_eff == 0 else _round_up(dim_in, tk_eff)
    elif dim_in <= SINGLE_K_MAX:
        tk_eff = dim_in
        k_ext = dim_in
    else:
        # Rare fallback for huge dim_in: K must be exact, so zero-pad minimally
        # to a multiple of 128 and tile with a divisor of the padded extent.
        k_ext = _round_up(dim_in, 128)
        tk_eff = next(c for c in (2048, 1024, 512, 256, 128) if k_ext % c == 0)
    grid_k = k_ext // tk_eff
    single_k = grid_k == 1
    if single_k:
        tk_eff = k_ext

    if k_ext != dim_in:
        # Exact zero-padding of the reduction axis only (never M or N).
        x_flat = jnp.pad(x_flat, ((0, 0), (0, k_ext - dim_in)))
        w_kn = jnp.pad(w_kn, ((0, k_ext - dim_in), (0, 0)))

    # ---------------- N: pin the whole weight when it is small ----------------
    W_PIN_TILE_BYTES = 4 << 20
    if tn is not None:
        tn_eff = tn
    elif dim_out <= 512 or tk_eff * dim_out * wsz <= W_PIN_TILE_BYTES:
        tn_eff = dim_out                 # single N block: W + bias stay VMEM-resident
    else:
        tn_eff = 512 if dim_out >= 512 else (256 if dim_out >= 256 else 128)
    grid_n = _cdiv(dim_out, tn_eff)

    # ---------------- M: large streamed-x tiles within a VMEM budget ----------
    if tm is not None:
        tm_eff = tm
    else:
        per_row = 2 * tk_eff * xsz + 2 * tn_eff * osz + (0 if single_k else 4 * tn_eff)
        budget = max((12 << 20) - 2 * tk_eff * tn_eff * wsz, 2 << 20)
        tm_budget = max(8, min(8192, budget // per_row))
        tm_budget = (tm_budget // 8) * 8
        if m <= tm_budget:
            if m >= 2048:
                # Split into two M tiles so both v7x TensorCores get work.
                tm_eff = _round_up(_cdiv(m, 2), 8)
            else:
                tm_eff = m               # full-dim block (legal for any m)
        else:
            tm_eff = tm_budget
    grid_m = _cdiv(m, tm_eff)

    # ---------------- VMEM limit (only raised when the estimate needs it) -----
    est_vmem = (2 * tm_eff * tk_eff * xsz
                + 2 * tk_eff * tn_eff * wsz
                + 2 * tm_eff * tn_eff * osz
                + 2 * tn_eff * bsz
                + (0 if single_k else tm_eff * tn_eff * 4))
    vmem_limit = None
    if est_vmem > (12 << 20):
        vmem_limit = int(min(64 << 20, max(32 << 20, est_vmem * 3 // 2)))

    # ---------------- Cost estimate with real (unpadded) sizes ----------------
    cost = pl.CostEstimate(
        flops=2 * m * dim_out * dim_in,
        transcendentals=0,
        bytes_accessed=(m * dim_in * xsz
                        + dim_in * dim_out * wsz
                        + dim_out * bsz
                        + m * dim_out * osz),
    )

    if single_k:
        grid = (grid_m, grid_n)
        in_specs = [
            pl.BlockSpec((tm_eff, tk_eff), lambda i, j: (i, 0)),   # x tile (streams)
            pl.BlockSpec((tk_eff, tn_eff), lambda i, j: (0, j)),   # W (K,N) tile (pinned if grid_n==1)
            pl.BlockSpec((1, tn_eff), lambda i, j: (0, j)),        # bias tile
        ]
        out_specs = pl.BlockSpec((tm_eff, tn_eff), lambda i, j: (i, j))
        scratch_shapes = []
        kernel = _linear_bias_kernel
        dim_sem = ("parallel", "parallel")
    else:
        grid = (grid_m, grid_n, grid_k)
        in_specs = [
            pl.BlockSpec((tm_eff, tk_eff), lambda i, j, k: (i, k)),
            pl.BlockSpec((tk_eff, tn_eff), lambda i, j, k: (k, j)),
            pl.BlockSpec((1, tn_eff), lambda i, j, k: (0, j)),
        ]
        out_specs = pl.BlockSpec((tm_eff, tn_eff), lambda i, j, k: (i, j))
        scratch_shapes = [pltpu.VMEM((tm_eff, tn_eff), jnp.float32)]
        kernel = _linear_bias_acc_kernel
        dim_sem = ("parallel", "parallel", "arbitrary")

    out_flat = pl.pallas_call(
        kernel,
        out_shape=jax.ShapeDtypeStruct((m, dim_out), out_dtype),
        grid_spec=pltpu.PrefetchScalarGridSpec(
            num_scalar_prefetch=0,
            grid=grid,
            in_specs=in_specs,
            out_specs=out_specs,
            scratch_shapes=scratch_shapes,
        ),
        compiler_params=pltpu.CompilerParams(
            dimension_semantics=dim_sem,
            vmem_limit_bytes=vmem_limit,
        ),
        cost_estimate=cost,
    )(x_flat, w_kn, b2d)

    return out_flat.reshape(*lead_shape, dim_out)


if __name__ == "__main__":
    key = jax.random.PRNGKey(0)
    kx, kw, kb, kx2, kw2, kb2 = jax.random.split(key, 6)

    # ---- Test 1: canonical StreamEmbed shapes (single-K, pinned-W fast path) ----
    batch, seq, a, b = 2, 8, 4, 8           # dim_in = 4 * 8 = 32
    dim_in, dim_out = a * b, 16

    x = jax.random.normal(kx, (batch, seq, a, b), dtype=jnp.float32)
    bound = 1.0 / math.sqrt(dim_in)
    weight = jax.random.uniform(kw, (dim_out, dim_in), minval=-bound, maxval=bound,
                                dtype=jnp.float32)
    bias = jax.random.uniform(kb, (dim_out,), minval=-bound, maxval=bound,
                              dtype=jnp.float32)

    out = jax.block_until_ready(stream_embed_linear(x, weight, bias))
    ref = x.reshape(batch, seq, dim_in) @ weight.T + bias
    assert out.shape == (batch, seq, dim_out)
    assert jnp.allclose(out, ref, atol=1e-5, rtol=1e-5)

    # ---- Test 2: ragged M grid (no wrapper padding, masked last output block) ----
    b2, s2, a2, c2 = 3, 7, 5, 8             # m = 21, dim_in = 40
    d_out2 = 24
    x2 = jax.random.normal(kx2, (b2, s2, a2, c2), dtype=jnp.float32)
    w2 = jax.random.uniform(kw2, (d_out2, a2 * c2), minval=-0.2, maxval=0.2,
                            dtype=jnp.float32)
    bias2 = jax.random.uniform(kb2, (d_out2,), minval=-0.2, maxval=0.2,
                               dtype=jnp.float32)

    out2 = jax.block_until_ready(stream_embed_linear(x2, w2, bias2, tm=8))
    ref2 = x2.reshape(b2, s2, a2 * c2) @ w2.T + bias2
    assert out2.shape == (b2, s2, d_out2)
    assert jnp.allclose(out2, ref2, atol=1e-5, rtol=1e-5)

    print("KERNEL_OK")
</pallas_src>

<mosaic_0001>
module attributes {stable_mosaic.version = 11 : i64} {
  func.func @_linear_bias_kernel(%arg0: i32, %arg1: i32, %arg2: memref<16x32xf32, #tpu.memory_space<vmem>>, %arg3: memref<32x16xf32, #tpu.memory_space<vmem>>, %arg4: memref<1x16xf32, #tpu.memory_space<vmem>>, %arg5: memref<16x16xf32, #tpu.memory_space<vmem>>) attributes {dimension_semantics = [#tpu.dimension_semantics<parallel>, #tpu.dimension_semantics<parallel>], iteration_bounds = array<i64: 1, 1>, scalar_prefetch = 0 : i64, scratch_operands = 0 : i64, tpu.core_type = #tpu.core_type<tc>, window_params = [{transform_indices = @transform_0, window_bounds = array<i64: 16, 32>}, {transform_indices = @transform_1, window_bounds = array<i64: 32, 16>}, {transform_indices = @transform_2, window_bounds = array<i64: 1, 16>}, {transform_indices = @transform_3, window_bounds = array<i64: 16, 16>}]} {
    %c0 = arith.constant 0 : index
    %c0_0 = arith.constant 0 : index
    %0 = vector.load %arg2[%c0, %c0_0] : memref<16x32xf32, #tpu.memory_space<vmem>>, vector<16x32xf32>
    %c0_1 = arith.constant 0 : index
    %c0_2 = arith.constant 0 : index
    %1 = vector.load %arg3[%c0_1, %c0_2] : memref<32x16xf32, #tpu.memory_space<vmem>>, vector<32x16xf32>
    %cst = arith.constant dense<0.000000e+00> : vector<16x16xf32>
    %2 = tpu.matmul %0, %1, %cst {dimension_numbers = #tpu.dot_dimension_numbers<[1], [0], [0], [1], [0, 0, 1, 1], [], []>} : vector<16x32xf32>, vector<32x16xf32>, vector<16x16xf32> -> vector<16x16xf32>
    %c0_3 = arith.constant 0 : index
    %c0_4 = arith.constant 0 : index
    %3 = vector.load %arg4[%c0_3, %c0_4] : memref<1x16xf32, #tpu.memory_space<vmem>>, vector<1x16xf32>
    %4 = vector.broadcast %3 : vector<1x16xf32> to vector<16x16xf32>
    %5 = arith.addf %2, %4 : vector<16x16xf32>
    %c0_5 = arith.constant 0 : index
    %c0_6 = arith.constant 0 : index
    %6 = vector.load %arg5[%c0_5, %c0_6] : memref<16x16xf32, #tpu.memory_space<vmem>>, vector<16x16xf32>
    tpu.vector_store %arg5[%c0_5, %c0_6], %5 {strides = array<i32>} : memref<16x16xf32, #tpu.memory_space<vmem>>, vector<16x16xf32>,
    return
  }
  func.func @transform_0(%arg0: i32, %arg1: i32) -> (i32, i32) {
    %c0_i32 = arith.constant 0 : i32
    %c0_i32_0 = arith.constant 0 : i32
    return %arg0, %c0_i32 : i32, i32
  }
  func.func @transform_1(%arg0: i32, %arg1: i32) -> (i32, i32) {
    %c0_i32 = arith.constant 0 : i32
    %c0_i32_0 = arith.constant 0 : i32
    return %c0_i32, %arg1 : i32, i32
  }
  func.func @transform_2(%arg0: i32, %arg1: i32) -> (i32, i32) {
    %c0_i32 = arith.constant 0 : i32
    %c0_i32_0 = arith.constant 0 : i32
    return %c0_i32, %arg1 : i32, i32
  }
  func.func @transform_3(%arg0: i32, %arg1: i32) -> (i32, i32) {
    %c0_i32 = arith.constant 0 : i32
    return %arg0, %arg1 : i32, i32
  }
}

</mosaic_0001>

<bundles_post_ra>
// kernel: tpu_custom_call.1
= control target key start
LH: loop header
LB: loop body
LE: loop exit
PB: predicated region body
PF: predicated region fallthrough
CT: control target
= control target key end

     0   :  { %s159_s0 = inlined_call_operand.vmem [shape: f32[16,32], index: 0, kind: input, shape index: {}]   ;;  %s160_s1 = inlined_call_operand.vmem [shape: f32[32,16], index: 1, kind: input, shape index: {}]   ;;  %s161_s2 = inlined_call_operand.vmem [shape: f32[1,16], index: 2, kind: input, shape index: {}]   ;;  %s162_s3 = inlined_call_operand.hbm [shape: f32[16,16], index: 3, kind: output, shape index: {}]  }
   0x1   :  { %v20_v0 = vld [vmem:[%s160_s1 + $0x18] sm:$0xff]  ;;  %v19_v1 = vld [vmem:[%s160_s1 + $0x10] sm:$0xff]  ;;  %v18_v2 = vld [vmem:[%s160_s1 + $0x8] sm:$0xff] }
   0x2   :  { %44 = vmatpush.msra.mxu0 %v20_v0  ;;  %78 = vmatpush.msra.mxu1 %v20_v0 }
   0x3   :  { %8 = vsyncpa [#allocation3], 0  ;;  %v17_v3 = vld [vmem:[%s160_s1] sm:$0xff]  ;;  %vm25_vm0 = vcmask 261120   ;;  %v16_v5 = vld [vmem:[%s159_s0 + $0x8] sm:$0xff]  ;;  %s112_s1 = smov [#allocation2]  }
   0x4   :  { %45 = vmatpush.msra.mxu0 %v19_v1  ;;  %79 = vmatpush.msra.mxu1 %v19_v1  ;;  %v15_v4 = vld [vmem:[%s159_s0] sm:$0xff]  ;;  %s62_s26 = sshll.u32 %s112_s1, 4  ;;  %s64_s29 = sshll.u32 %s162_s3, 4  ;;  %vm55_vm1 = vcmask 130048   ;;  %s63_s26 = int_to_ptr.vmem [resolvable:$true] %s62_s26  ;;  %s65_s29 = int_to_ptr.hbm [resolvable:$true] %s64_s29 }
   0x5   :  { %v85_v6 = vld [vmem:[%s161_s2] ss:$0 sm:$0xff]  ;;  %s113_s0 = smov 128   ;;  %s114_s30 = smov 8  }
   0x6   :  { %46 = vmatpush.msra.mxu0 %v18_v2  ;;  %80 = vmatpush.msra.mxu1 %v18_v2 }
   0x8   :  { %47 = vmatpush.msra.mxu0 %v17_v3  ;;  %81 = vmatpush.msra.mxu1 %v17_v3 }
   0x9   :  { %76 = vmatmul.msk.f32.vlgmr.msra.gmra.mxu0 %vm25_vm0, %v15_v4  ;;  %77 = vmatmul.msk.f32.vlgmr.msra.gmra.mxu1 %vm25_vm0, %v16_v5 }
  0x86   :  { %v49_v7 = vpop.f32.mrf.mxu0  ;;  %v52_v8 = vpop.f32.mrf.mxu1 }
  0x87   :  { %v50_v9 = vadd.f32 %v85_v6, %v49_v7  ;;  %v53_v10 = vadd.f32 %v85_v6, %v52_v8 }
  0x89   :  { %56 = vst.msk [vmem:[#allocation2] sm:$0xff] %vm55_vm1, %v50_v9 }
  0x8a   :  { %57 = vst.msk [vmem:[#allocation2 + $0x8] sm:$0xff] %vm55_vm1, %v53_v10 }
  0x8b   :  { %70 = dma.vmem_to_hbm [thread:$0]  %s63_s26, 256, %s65_s29, [#allocation3], %s113_s0, %s113_s0, %s114_s30  }
  0x8c   :  { %110 = dma.done.wait [#allocation3], 256  }
  0x8d   :  { %111 = vsyncadd [#allocation3], 4294967040 }
  0x8e   :  { %75 = vsyncpa [#allocation3], 1 }

</bundles_post_ra>
